<compile_context>
chip_gen: v6e
topology: v6e:2x2x1
jax: 0.10.0
libtpu: 0.0.40
codegen_flags: <defaults>
</compile_context>

<pallas_src>
import jax
import jax.numpy as jnp
from jax.experimental import pallas as pl
from jax.experimental.pallas import tpu as pltpu


_STREAM_VMEM_LIMIT = 40 * 1024 * 1024     # streaming fallback (~4 MiB blocks)
_STREAM_BLOCK_BYTES = 4 * 1024 * 1024     # target input-block bytes, fallback
_STREAM_LANE = 512                        # lane width of streaming tiles
_MIN_VMEM_LIMIT = 32 * 1024 * 1024


def _vmem_capacity_bytes():
    """Physical VMEM per TensorCore; conservative 64 MiB (v7x) if unknown."""
    try:
        return int(getattr(pltpu.get_tpu_info(), "vmem_capacity_bytes",
                           64 * 1024 * 1024))
    except Exception:
        return 64 * 1024 * 1024


def _chunk_bounds(c):
    """torch.split(3, dim=0) + split of a trailing 2-channel chunk into 1+1."""
    bounds, i = [], 0
    while i < c:
        n = min(3, c - i)
        if n == 2:
            bounds.append((i, i + 1))
            bounds.append((i + 1, i + 2))
        else:
            bounds.append((i, i + n))
        i += n
    return bounds


def _factor_spatial(n):
    """Factor H*W = R * L with L a multiple of 128 (prefer R % 8 == 0, large L)
    so per-channel data fills both sublanes and lanes.  Falls back to (1, n),
    which is always legal (full-dim block) but has poor vreg fill."""
    best = None
    for l in (2048, 1024, 512, 256, 128):
        if n % l == 0:
            r = n // l
            if r % 8 == 0:
                return r, l
            if best is None:
                best = (r, l)
    if best is not None:
        return best
    # TODO(synk): spatial sizes with no multiple-of-128 divisor keep a 1-row
    # layout in the fused path; padding here would cost an extra HBM copy.
    return 1, n


# ------------------------- fused single-pass kernel ------------------------- #

def _fused_chunk_kernel(x_ref, o_ref):
    # x_ref / o_ref: (chunk_c, R, L) -- the whole chunk is resident in VMEM.
    x = x_ref[...]
    # min/max in the input dtype (exact for bf16); upcast only the scalars.
    mn = jnp.min(x).astype(jnp.float32)
    mx = jnp.max(x).astype(jnp.float32)
    scale = 255.0 / mx                       # one divide per chunk (hoisted)
    deq = mx * (1.0 / 255.0)
    xf = x.astype(jnp.float32)
    # PIL round trip == 8-bit quantize/dequantize.  (x - mn) >= 0 by
    # construction so only the upper clamp is needed.  NOTE: torchvision's
    # to_pil_image wraps mod 256 when the normalized value leaves [0, 1]
    # (chunks with negative min or negative max); we saturate instead.
    q = jnp.minimum(jnp.trunc((xf - mn) * scale), 255.0)
    o_ref[...] = (q * deq + mn).astype(o_ref.dtype)


def _fused_group(x3, chan_start, chunk_c, n_chunks, out_dtype, vmem_limit):
    """Fused min/max + quantize/dequantize for n_chunks chunks of chunk_c
    channels starting at channel chan_start of the (C, R, L) view."""
    _, r_dim, l_dim = x3.shape
    base = chan_start // chunk_c   # chan_start == 0 (3-chunks) or chunk_c == 1
    return pl.pallas_call(
        _fused_chunk_kernel,
        out_shape=jax.ShapeDtypeStruct((chunk_c * n_chunks, r_dim, l_dim),
                                       out_dtype),
        grid_spec=pltpu.PrefetchScalarGridSpec(
            num_scalar_prefetch=0,
            grid=(n_chunks,),
            in_specs=[pl.BlockSpec((chunk_c, r_dim, l_dim),
                                   lambda i: (base + i, 0, 0))],
            out_specs=pl.BlockSpec((chunk_c, r_dim, l_dim),
                                   lambda i: (i, 0, 0))),
        compiler_params=pltpu.CompilerParams(
            dimension_semantics=("parallel",),
            vmem_limit_bytes=vmem_limit),
    )(x3)


# ----------------------- two-pass streaming fallback ------------------------ #

def _minmax_stream_kernel(x_ref, min_ref, max_ref, min_sc, max_sc):
    r = pl.program_id(0)

    @pl.when(r == 0)
    def _():
        min_sc[...] = jnp.full_like(min_sc, jnp.inf)
        max_sc[...] = jnp.full_like(max_sc, -jnp.inf)

    x = x_ref[...]                                     # (C, RT, L), input dtype
    min_sc[...] = jnp.minimum(min_sc[...], jnp.min(x, axis=1).astype(jnp.float32))
    max_sc[...] = jnp.maximum(max_sc[...], jnp.max(x, axis=1).astype(jnp.float32))

    @pl.when(r == pl.num_programs(0) - 1)
    def _():
        min_ref[...] = jnp.min(min_sc[...], axis=1, keepdims=True)
        max_ref[...] = jnp.max(max_sc[...], axis=1, keepdims=True)


def _qdq_stream_kernel(x_ref, stats_ref, o_ref):
    x = x_ref[...].astype(jnp.float32)                 # (C, RT, L)
    mn = stats_ref[0][:, :, None]                      # (C, 1, 1)
    mx = stats_ref[1][:, :, None]
    scale = 255.0 / mx                                 # C divides per block
    deq = mx * (1.0 / 255.0)
    q = jnp.minimum(jnp.trunc((x - mn) * scale), 255.0)
    o_ref[...] = (q * deq + mn).astype(o_ref.dtype)


def _chunk_reduce(per_chan, reduce_fn, c):
    """Reduce a (c,) per-channel vector within each chunk (chunks are 3
    channels, then trailing 1-channel chunks) and broadcast back to (c,)."""
    k3 = c // 3
    parts = []
    if k3:
        a = per_chan[:3 * k3].reshape(k3, 3)
        r = reduce_fn(a, axis=1, keepdims=True)
        parts.append(jnp.broadcast_to(r, (k3, 3)).reshape(-1))
    if c % 3:
        parts.append(per_chan[3 * k3:])
    return parts[0] if len(parts) == 1 else jnp.concatenate(parts)


def _two_pass(x2d, out_dtype):
    """Streaming fallback for chunks too large to keep resident in VMEM."""
    c, n = x2d.shape
    itemsize = jnp.dtype(x2d.dtype).itemsize
    lane = _STREAM_LANE
    rt = _STREAM_BLOCK_BYTES // (c * lane * itemsize)
    rt = max(8, min(1024, (rt // 8) * 8))              # rows per tile (mult of 8)
    block_elems = rt * lane
    n_pad = -(-n // block_elems) * block_elems
    if n_pad != n:
        # Edge-replicate pad: cannot perturb per-channel min/max; the padded
        # tail of the output is sliced off below.
        x2d = jnp.pad(x2d, ((0, 0), (0, n_pad - n)), mode="edge")
    r_dim = n_pad // lane
    x3 = x2d.reshape(c, r_dim, lane)
    n_rt = r_dim // rt

    # ---- pass 1: per-channel min/max accumulated in VMEM scratch ----
    pmin, pmax = pl.pallas_call(
        _minmax_stream_kernel,
        out_shape=(jax.ShapeDtypeStruct((c, 1), jnp.float32),
                   jax.ShapeDtypeStruct((c, 1), jnp.float32)),
        grid_spec=pltpu.PrefetchScalarGridSpec(
            num_scalar_prefetch=0,
            grid=(n_rt,),
            in_specs=[pl.BlockSpec((c, rt, lane), lambda r: (0, r, 0))],
            out_specs=[pl.BlockSpec((c, 1), lambda r: (0, 0)),
                       pl.BlockSpec((c, 1), lambda r: (0, 0))],
            scratch_shapes=[pltpu.VMEM((c, lane), jnp.float32),
                            pltpu.VMEM((c, lane), jnp.float32)]),
        compiler_params=pltpu.CompilerParams(
            dimension_semantics=("arbitrary",),
            vmem_limit_bytes=_STREAM_VMEM_LIMIT),
    )(x3)

    # Tiny per-chunk combine in plain JAX (C scalars).
    chunk_min = _chunk_reduce(pmin[:, 0], jnp.min, c)
    chunk_max = _chunk_reduce(pmax[:, 0], jnp.max, c)
    stats = jnp.stack([chunk_min, chunk_max]).reshape(2, c, 1).astype(jnp.float32)

    # ---- pass 2: streaming quantize / dequantize / reconstruct ----
    out3 = pl.pallas_call(
        _qdq_stream_kernel,
        out_shape=jax.ShapeDtypeStruct((c, r_dim, lane), out_dtype),
        grid_spec=pltpu.PrefetchScalarGridSpec(
            num_scalar_prefetch=0,
            grid=(n_rt,),
            in_specs=[pl.BlockSpec((c, rt, lane), lambda r: (0, r, 0)),
                      pl.BlockSpec((2, c, 1), lambda r: (0, 0, 0))],
            out_specs=pl.BlockSpec((c, rt, lane), lambda r: (0, r, 0))),
        compiler_params=pltpu.CompilerParams(
            dimension_semantics=("parallel",),
            vmem_limit_bytes=_STREAM_VMEM_LIMIT),
    )(x3, stats)
    return out3.reshape(c, n_pad)[:, :n]


# --------------------------------- module ---------------------------------- #

def pil_tensor_module(x):
    """JAX/Pallas equivalent of PILTensorModule.forward (returns_file_size=False).

    x: (C, H, W) tensor.  Returns the reconstructed (C, H, W) tensor in the
    input floating dtype (float32 for non-float inputs).
    """
    c, h, w = x.shape
    n = h * w
    out_dtype = x.dtype if jnp.issubdtype(x.dtype, jnp.floating) else jnp.float32
    in_item = jnp.dtype(x.dtype).itemsize
    out_item = jnp.dtype(out_dtype).itemsize

    n3 = 3 * (c // 3)                  # channels living in 3-channel chunks
    n1 = c - n3                        # trailing 1-channel chunks (0, 1 or 2)
    max_chunk_c = 3 if n3 else 1

    # ---- fused-path gate: whole chunk resident in VMEM ----
    blk_f32 = max_chunk_c * n * 4
    est_vmem = (2 * max_chunk_c * n * in_item      # double-buffered input block
                + 2 * max_chunk_c * n * out_item   # double-buffered output block
                + 2 * blk_f32                      # elementwise f32 temporaries
                + (4 << 20))                       # headroom
    cap = _vmem_capacity_bytes()
    if est_vmem <= int(0.8 * cap):
        r_dim, l_dim = _factor_spatial(n)
        x3 = x.reshape(c, r_dim, l_dim)            # free contiguous view
        vmem_limit = min(int(0.8 * cap), max(est_vmem, _MIN_VMEM_LIMIT))
        outs = []
        if n3:
            outs.append(_fused_group(x3, 0, 3, n3 // 3, out_dtype, vmem_limit))
        if n1:
            outs.append(_fused_group(x3, n3, 1, n1, out_dtype, vmem_limit))
        out3 = outs[0] if len(outs) == 1 else jnp.concatenate(outs, axis=0)
        out = out3.reshape(c, h, w)
    else:
        # Chunk does not fit VMEM: two-pass streaming fallback (3N HBM bytes).
        out = _two_pass(x.reshape(c, n), out_dtype).reshape(c, h, w)

    # TODO(synk): file_size accounting (BytesIO byte counts + pickled min/max
    # list sizes) is host-side I/O with no Pallas equivalent; omitted since
    # returns_file_size defaults to False.
    # TODO(synk): lossy save_kwargs (e.g. JPEG) are not modeled; the PIL round
    # trip is treated as a lossless 8-bit quantize/dequantize.
    return out


if __name__ == "__main__":
    key = jax.random.PRNGKey(0)
    # (C, H, W) = (4, 16, 16): exercises one 3-channel and one 1-channel chunk.
    x = jax.random.uniform(key, (4, 16, 16), dtype=jnp.float32,
                           minval=0.1, maxval=2.0)
    out = jax.block_until_ready(jax.jit(pil_tensor_module)(x))
    assert out.shape == x.shape and out.dtype == x.dtype

    # Pure-JAX reference (same math as the PyTorch module on a lossless codec).
    ref_chunks = []
    for s, e in _chunk_bounds(x.shape[0]):
        ch = x[s:e]
        mx, mn = jnp.max(ch), jnp.min(ch)
        q = jnp.clip(jnp.trunc((ch - mn) / mx * 255.0), 0.0, 255.0)
        ref_chunks.append(q / 255.0 * mx + mn)
    ref = jnp.concatenate(ref_chunks, axis=0)
    # Loose tolerance: hoisted 255/max scale may flip a trunc boundary by 1.
    assert float(jnp.max(jnp.abs(out - ref))) < 2e-2, "fused path mismatch"

    # Also exercise the streaming fallback once (used when a chunk > VMEM).
    out_fb = jax.block_until_ready(
        _two_pass(x.reshape(4, 16 * 16), jnp.float32)).reshape(4, 16, 16)
    assert float(jnp.max(jnp.abs(out_fb - ref))) < 2e-2, "fallback mismatch"
    print("KERNEL_OK")
</pallas_src>

<mosaic_0001>
module attributes {stable_mosaic.version = 11 : i64} {
  func.func @_fused_chunk_kernel(%arg0: i32, %arg1: memref<3x1x256xf32, #tpu.memory_space<vmem>>, %arg2: memref<3x1x256xf32, #tpu.memory_space<vmem>>) attributes {dimension_semantics = [#tpu.dimension_semantics<parallel>], iteration_bounds = array<i64: 1>, scalar_prefetch = 0 : i64, scratch_operands = 0 : i64, tpu.core_type = #tpu.core_type<tc>, window_params = [{transform_indices = @transform_0, window_bounds = array<i64: 3, 1, 256>}, {transform_indices = @transform_1, window_bounds = array<i64: 3, 1, 256>}]} {
    %c0 = arith.constant 0 : index
    %c0_0 = arith.constant 0 : index
    %c0_1 = arith.constant 0 : index
    %0 = vector.load %arg1[%c0, %c0_0, %c0_1] : memref<3x1x256xf32, #tpu.memory_space<vmem>>, vector<3x1x256xf32>
    %1 = vector.shape_cast %0 : vector<3x1x256xf32> to vector<1x3x1x256xf32>
    %cst = arith.constant dense<0x7F800000> : vector<1xf32>
    %2 = vector.multi_reduction <minimumf>, %1, %cst [1, 2, 3] : vector<1x3x1x256xf32> to vector<1xf32>
    %3 = vector.shape_cast %2 : vector<1xf32> to vector<1x1x1x1xf32>
    %4 = vector.extract %3[0, 0, 0, 0] : f32 from vector<1x1x1x1xf32>
    %5 = vector.shape_cast %0 : vector<3x1x256xf32> to vector<1x3x1x256xf32>
    %cst_2 = arith.constant dense<0xFF800000> : vector<1xf32>
    %6 = vector.multi_reduction <maximumf>, %5, %cst_2 [1, 2, 3] : vector<1x3x1x256xf32> to vector<1xf32>
    %7 = vector.shape_cast %6 : vector<1xf32> to vector<1x1x1x1xf32>
    %8 = vector.extract %7[0, 0, 0, 0] : f32 from vector<1x1x1x1xf32>
    %cst_3 = arith.constant 2.550000e+02 : f32
    %9 = arith.divf %cst_3, %8 : f32
    %cst_4 = arith.constant 0.00392156886 : f32
    %10 = arith.mulf %8, %cst_4 : f32
    %11 = vector.broadcast %4 : f32 to vector<3x1x256xf32>
    %12 = arith.subf %0, %11 : vector<3x1x256xf32>
    %13 = vector.broadcast %9 : f32 to vector<3x1x256xf32>
    %14 = arith.mulf %12, %13 : vector<3x1x256xf32>
    %cst_5 = arith.constant 0.000000e+00 : f32
    %15 = vector.broadcast %cst_5 : f32 to vector<3x1x256xf32>
    %16 = arith.cmpf olt, %14, %15 : vector<3x1x256xf32>
    %17 = math.ceil %14 : vector<3x1x256xf32>
    %18 = math.floor %14 : vector<3x1x256xf32>
    %19 = arith.select %16, %17, %18 : vector<3x1x256xi1>, vector<3x1x256xf32>
    %cst_6 = arith.constant 2.550000e+02 : f32
    %20 = vector.broadcast %cst_6 : f32 to vector<3x1x256xf32>
    %21 = arith.minimumf %19, %20 : vector<3x1x256xf32>
    %22 = vector.broadcast %10 : f32 to vector<3x1x256xf32>
    %23 = arith.mulf %21, %22 : vector<3x1x256xf32>
    %24 = vector.broadcast %4 : f32 to vector<3x1x256xf32>
    %25 = arith.addf %23, %24 : vector<3x1x256xf32>
    %c0_7 = arith.constant 0 : index
    %c0_8 = arith.constant 0 : index
    %c0_9 = arith.constant 0 : index
    %26 = vector.load %arg2[%c0_7, %c0_8, %c0_9] : memref<3x1x256xf32, #tpu.memory_space<vmem>>, vector<3x1x256xf32>
    tpu.vector_store %arg2[%c0_7, %c0_8, %c0_9], %25 {strides = array<i32>} : memref<3x1x256xf32, #tpu.memory_space<vmem>>, vector<3x1x256xf32>,
    return
  }
  func.func @transform_0(%arg0: i32) -> (i32, i32, i32) {
    %c0_i32 = arith.constant 0 : i32
    %0 = arith.addi %c0_i32, %arg0 : i32
    %c0_i32_0 = arith.constant 0 : i32
    %c0_i32_1 = arith.constant 0 : i32
    %c0_i32_2 = arith.constant 0 : i32
    return %0, %c0_i32_0, %c0_i32_1 : i32, i32, i32
  }
  func.func @transform_1(%arg0: i32) -> (i32, i32, i32) {
    %c0_i32 = arith.constant 0 : i32
    %c0_i32_0 = arith.constant 0 : i32
    %c0_i32_1 = arith.constant 0 : i32
    return %arg0, %c0_i32, %c0_i32_0 : i32, i32, i32
  }
}

module attributes {stable_mosaic.version = 11 : i64} {
  func.func @_fused_chunk_kernel(%arg0: i32, %arg1: memref<1x1x256xf32, #tpu.memory_space<vmem>>, %arg2: memref<1x1x256xf32, #tpu.memory_space<vmem>>) attributes {dimension_semantics = [#tpu.dimension_semantics<parallel>], iteration_bounds = array<i64: 1>, scalar_prefetch = 0 : i64, scratch_operands = 0 : i64, tpu.core_type = #tpu.core_type<tc>, window_params = [{transform_indices = @transform_0, window_bounds = array<i64: 1, 1, 256>}, {transform_indices = @transform_1, window_bounds = array<i64: 1, 1, 256>}]} {
    %c0 = arith.constant 0 : index
    %c0_0 = arith.constant 0 : index
    %c0_1 = arith.constant 0 : index
    %0 = vector.load %arg1[%c0, %c0_0, %c0_1] : memref<1x1x256xf32, #tpu.memory_space<vmem>>, vector<1x1x256xf32>
    %1 = vector.shape_cast %0 : vector<1x1x256xf32> to vector<1x1x1x256xf32>
    %cst = arith.constant dense<0x7F800000> : vector<1xf32>
    %2 = vector.multi_reduction <minimumf>, %1, %cst [1, 2, 3] : vector<1x1x1x256xf32> to vector<1xf32>
    %3 = vector.shape_cast %2 : vector<1xf32> to vector<1x1x1x1xf32>
    %4 = vector.extract %3[0, 0, 0, 0] : f32 from vector<1x1x1x1xf32>
    %5 = vector.shape_cast %0 : vector<1x1x256xf32> to vector<1x1x1x256xf32>
    %cst_2 = arith.constant dense<0xFF800000> : vector<1xf32>
    %6 = vector.multi_reduction <maximumf>, %5, %cst_2 [1, 2, 3] : vector<1x1x1x256xf32> to vector<1xf32>
    %7 = vector.shape_cast %6 : vector<1xf32> to vector<1x1x1x1xf32>
    %8 = vector.extract %7[0, 0, 0, 0] : f32 from vector<1x1x1x1xf32>
    %cst_3 = arith.constant 2.550000e+02 : f32
    %9 = arith.divf %cst_3, %8 : f32
    %cst_4 = arith.constant 0.00392156886 : f32
    %10 = arith.mulf %8, %cst_4 : f32
    %11 = vector.broadcast %4 : f32 to vector<1x1x256xf32>
    %12 = arith.subf %0, %11 : vector<1x1x256xf32>
    %13 = vector.broadcast %9 : f32 to vector<1x1x256xf32>
    %14 = arith.mulf %12, %13 : vector<1x1x256xf32>
    %cst_5 = arith.constant 0.000000e+00 : f32
    %15 = vector.broadcast %cst_5 : f32 to vector<1x1x256xf32>
    %16 = arith.cmpf olt, %14, %15 : vector<1x1x256xf32>
    %17 = math.ceil %14 : vector<1x1x256xf32>
    %18 = math.floor %14 : vector<1x1x256xf32>
    %19 = arith.select %16, %17, %18 : vector<1x1x256xi1>, vector<1x1x256xf32>
    %cst_6 = arith.constant 2.550000e+02 : f32
    %20 = vector.broadcast %cst_6 : f32 to vector<1x1x256xf32>
    %21 = arith.minimumf %19, %20 : vector<1x1x256xf32>
    %22 = vector.broadcast %10 : f32 to vector<1x1x256xf32>
    %23 = arith.mulf %21, %22 : vector<1x1x256xf32>
    %24 = vector.broadcast %4 : f32 to vector<1x1x256xf32>
    %25 = arith.addf %23, %24 : vector<1x1x256xf32>
    %c0_7 = arith.constant 0 : index
    %c0_8 = arith.constant 0 : index
    %c0_9 = arith.constant 0 : index
    %26 = vector.load %arg2[%c0_7, %c0_8, %c0_9] : memref<1x1x256xf32, #tpu.memory_space<vmem>>, vector<1x1x256xf32>
    tpu.vector_store %arg2[%c0_7, %c0_8, %c0_9], %25 {strides = array<i32>} : memref<1x1x256xf32, #tpu.memory_space<vmem>>, vector<1x1x256xf32>,
    return
  }
  func.func @transform_0(%arg0: i32) -> (i32, i32, i32) {
    %c3_i32 = arith.constant 3 : i32
    %0 = arith.addi %c3_i32, %arg0 : i32
    %c0_i32 = arith.constant 0 : i32
    %c0_i32_0 = arith.constant 0 : i32
    %c0_i32_1 = arith.constant 0 : i32
    return %0, %c0_i32, %c0_i32_0 : i32, i32, i32
  }
  func.func @transform_1(%arg0: i32) -> (i32, i32, i32) {
    %c0_i32 = arith.constant 0 : i32
    %c0_i32_0 = arith.constant 0 : i32
    %c0_i32_1 = arith.constant 0 : i32
    return %arg0, %c0_i32, %c0_i32_0 : i32, i32, i32
  }
}

</mosaic_0001>

<bundles_post_ra>
// kernel: pil_tensor_module.2
= control target key start
LH: loop header
LB: loop body
LE: loop exit
PB: predicated region body
PF: predicated region fallthrough
CT: control target
= control target key end

     0   :  { %v14_v0 = vlaneseq  ;;  %vm44_vm0 = vcmask 1040384   ;;  %s200_s0 = inlined_call_operand.vmem [shape: f32[4,1,256], index: 0, kind: input, shape index: {}]   ;;  %s201_s1 = inlined_call_operand.vmem [shape: f32[3,1,256], index: 1, kind: output, shape index: {}]  }
   0x1   :  { %v153_v2 = vld [vmem:[%s200_s0] sm:$0x3]  ;;  %v158_v3 = vld [vmem:[%s200_s0 + $0x2] sm:$0x3]  ;;  %v163_v4 = vld [vmem:[%s200_s0 + $0x4] sm:$0x3] }
   0x2   :  { %v15_v1 = vshrl.u32 %v14_v0, 7  ;;  %vm122_vm4 = vcmp.lt.s32.totalorder %v14_v0, 256 }
   0x4   :  { %v16_v5 = vsub.s32 0, %v15_v1  ;;  %v20_v6 = vsub.s32 1, %v15_v1 }
   0x6   :  { %v17_v7 = vrot.slane %v153_v2, %v16_v5  ;;  %v21_v8 = vrot.slane %v153_v2, %v20_v6  ;;  %v25_v9 = vrot.slane %v158_v3, %v16_v5  ;;  %v29_v10 = vrot.slane %v158_v3, %v20_v6 }
   0x7   :  { %v33_v11 = vrot.slane %v163_v4, %v16_v5  ;;  %v37_v12 = vrot.slane %v163_v4, %v20_v6 }
   0x8   :  { %v45_v13 = vsel %vm44_vm0, %v17_v7, inf  ;;  %v46_v14 = vsel %vm44_vm0, %v21_v8, inf  ;;  %v47_v15 = vsel %vm44_vm0, %v25_v9, inf  ;;  %v48_v16 = vsel %vm44_vm0, %v29_v10, inf }
   0x9   :  { %v49_v17 = vsel %vm44_vm0, %v33_v11, inf  ;;  %v51_v18 = vsel %vm44_vm0, %v37_v12, inf  ;;  %v54_v19 = vmin.f32 %v47_v15, %v48_v16  ;;  %v65_v20 = vsel %vm44_vm0, %v17_v7, -inf }
   0xa   :  { %v50_v21 = vmin.f32 %v45_v13, %v49_v17  ;;  %v52_v22 = vmin.f32 %v46_v14, %v51_v18  ;;  %v66_v23 = vsel %vm44_vm0, %v21_v8, -inf  ;;  %v67_v24 = vsel %vm44_vm0, %v25_v9, -inf }
   0xb   :  { %v68_v25 = vsel %vm44_vm0, %v29_v10, -inf  ;;  %v69_v26 = vsel %vm44_vm0, %v33_v11, -inf  ;;  %v71_v27 = vsel %vm44_vm0, %v37_v12, -inf }
   0xc   :  { %v53_v28 = vmin.f32 %v50_v21, %v52_v22  ;;  %v70_v29 = vmax.f32 %v65_v20, %v69_v26  ;;  %v72_v30 = vmax.f32 %v66_v23, %v71_v27  ;;  %v74_v31 = vmax.f32 %v67_v24, %v68_v25 }
   0xe   :  { %v55_v32 = vmin.f32 %v53_v28, %v54_v19  ;;  %v73_v33 = vmax.f32 %v70_v29, %v72_v30 }
  0x10   :  { %56 = vmin.xlane.f32.xlu0 %v55_v32  ;;  %v75_v34 = vmax.f32 %v73_v33, %v74_v31 }
  0x14   :  { %76 = vmax.xlane.f32.xlu0 %v75_v34 }
  0x99   :  { %v57_v35 = vpop.xlane.xlu0 %56 }
  0x9a   :  { %v58_v36 = vrot.slane %v57_v35, 4 }
  0x9c   :  { %v59_v37 = vmin.f32 %v57_v35, %v58_v36 }
  0x9d   :  { %v77_v38 = vpop.xlane.xlu0 %76 }
  0x9e   :  { %v60_v39 = vrot.slane %v59_v37, 2  ;;  %v78_v40 = vrot.slane %v77_v38, 4 }
  0xa0   :  { %v79_v41 = vmax.f32 %v77_v38, %v78_v40  ;;  %v61_v42 = vmin.f32 %v59_v37, %v60_v39 }
  0xa2   :  { %v80_v43 = vrot.slane %v79_v41, 2  ;;  %v62_v44 = vrot.slane %v61_v42, 1 }
  0xa4   :  { %v81_v45 = vmax.f32 %v79_v41, %v80_v43  ;;  %v63_v46 = vmin.f32 %v61_v42, %v62_v44 }
  0xa6   :  { %131 = vpush %v63_v46  ;;  %v82_v47 = vrot.slane %v81_v45, 1 }
  0xa8   :  { %v83_v48 = vmax.f32 %v81_v45, %v82_v47 }
  0xaa   :  { %133 = vpush %v83_v48 }
  0xd7   :  { %s132_s0 = spop %131 }
  0xd8   :  { %v90_v51 = vstv %s132_s0 }
  0xd9   :  { %v91_v52 = vsub.f32 %v153_v2, %v90_v51  ;;  %v92_v53 = vsub.f32 %v158_v3, %v90_v51  ;;  %v93_v54 = vsub.f32 %v163_v4, %v90_v51 }
  0xdb   :  { %s183_s12 = spop %133 }
  0xdc   :  { %v85_v49 = vstv %s183_s12  ;;  %s89_s15 = smul.f32 0.003921569, %s183_s12 }
  0xdd   :  { %137 = vrcp.f32 %v85_v49 }
  0xde   :  { %v113_v4 = vstv %s89_s15 }
  0xea   :  { %v138_v50 = vpop.eup %137 }
  0xeb   :  { %135 = vpush %v138_v50 }
 0x11c   :  { %s136_s13 = spop %135 }
 0x11d   :  { %s88_s14 = smul.f32 255.0, %s136_s13 }
 0x11f   :  { %v94_v55 = vstv %s88_s14 }
 0x120   :  { %v95_v56 = vmul.f32 %v94_v55, %v91_v52  ;;  %v96_v57 = vmul.f32 %v94_v55, %v92_v53  ;;  %v97_v58 = vmul.f32 %v94_v55, %v93_v54 }
 0x122   :  { %vm98_vm1 = vcmp.lt.f32.partialorder %v95_v56, 0.0  ;;  %vm99_vm2 = vcmp.lt.f32.partialorder %v96_v57, 0.0  ;;  %vm100_vm3 = vcmp.lt.f32.partialorder %v97_v58, 0.0  ;;  %v101_v59 = vceil.f32 %v95_v56 }
 0x123   :  { %v102_v60 = vceil.f32 %v96_v57  ;;  %v103_v61 = vceil.f32 %v97_v58  ;;  %v104_v62 = vfloor.f32 %v95_v56  ;;  %v105_v63 = vfloor.f32 %v96_v57 }
 0x124   :  { %v106_v1 = vfloor.f32 %v97_v58 }
 0x125   :  { %v107_v5 = vsel %vm98_vm1, %v101_v59, %v104_v62  ;;  %v108_v2 = vsel %vm99_vm2, %v102_v60, %v105_v63 }
 0x126   :  { %v109_v6 = vsel %vm100_vm3, %v103_v61, %v106_v1  ;;  %v110_v3 = vmin.f32 %v107_v5, 255.0  ;;  %v111_v7 = vmin.f32 %v108_v2, 255.0 }
 0x127   :  { %v112_v8 = vmin.f32 %v109_v6, 255.0 }
 0x128   :  { %v114_v9 = vmul.f32 %v113_v4, %v110_v3  ;;  %v115_v10 = vmul.f32 %v113_v4, %v111_v7 }
 0x129   :  { %v116_v11 = vmul.f32 %v113_v4, %v112_v8 }
 0x12a   :  { %v117_v12 = vadd.f32 %v114_v9, %v90_v51  ;;  %v118_v13 = vadd.f32 %v115_v10, %v90_v51 }
 0x12b   :  { %v119_v14 = vadd.f32 %v116_v11, %v90_v51 }
 0x12c   :  { %124 = vst.msk [vmem:[%s201_s1] sm:$0x3] %vm122_vm4, %v117_v12  ;;  %125 = vst.msk [vmem:[%s201_s1 + $0x2] sm:$0x3] %vm122_vm4, %v118_v13 }
 0x12d   :  { %126 = vst.msk [vmem:[%s201_s1 + $0x4] sm:$0x3] %vm122_vm4, %v119_v14 }

// kernel: pil_tensor_module.3
= control target key start
LH: loop header
LB: loop body
LE: loop exit
PB: predicated region body
PF: predicated region fallthrough
CT: control target
= control target key end

     0   :  { %v27_v0 = vlaneseq  ;;  %vm37_vm0 = vcmask 1040384   ;;  %s119_s0 = inlined_call_operand.vmem [shape: f32[4,1,256], index: 0, kind: input, shape index: {}]   ;;  %s120_s1 = inlined_call_operand.vmem [shape: f32[1,1,256], index: 1, kind: output, shape index: {}]  }
   0x1   :  { %v94_v2 = vld [vmem:[%s119_s0 + $0x6] sm:$0x3] }
   0x2   :  { %v28_v1 = vshrl.u32 %v27_v0, 7  ;;  %vm81_vm2 = vcmp.lt.s32.totalorder %v27_v0, 256 }
   0x4   :  { %v29_v3 = vsub.s32 0, %v28_v1  ;;  %v33_v4 = vsub.s32 1, %v28_v1 }
   0x6   :  { %v30_v5 = vrot.slane %v94_v2, %v29_v3  ;;  %v34_v6 = vrot.slane %v94_v2, %v33_v4 }
   0x8   :  { %v38_v7 = vsel %vm37_vm0, %v30_v5, inf  ;;  %v39_v8 = vsel %vm37_vm0, %v34_v6, inf  ;;  %v50_v9 = vsel %vm37_vm0, %v30_v5, -inf  ;;  %v51_v10 = vsel %vm37_vm0, %v34_v6, -inf }
   0x9   :  { %v40_v11 = vmin.f32 %v38_v7, %v39_v8  ;;  %v52_v12 = vmax.f32 %v50_v9, %v51_v10 }
   0xb   :  { %41 = vmin.xlane.f32.xlu0 %v40_v11 }
   0xf   :  { %53 = vmax.xlane.f32.xlu0 %v52_v12 }
  0x94   :  { %v42_v13 = vpop.xlane.xlu0 %41 }
  0x95   :  { %v43_v14 = vrot.slane %v42_v13, 4 }
  0x97   :  { %v44_v15 = vmin.f32 %v42_v13, %v43_v14 }
  0x98   :  { %v54_v16 = vpop.xlane.xlu0 %53 }
  0x99   :  { %v45_v17 = vrot.slane %v44_v15, 2  ;;  %v55_v18 = vrot.slane %v54_v16, 4 }
  0x9b   :  { %v56_v19 = vmax.f32 %v54_v16, %v55_v18  ;;  %v46_v20 = vmin.f32 %v44_v15, %v45_v17 }
  0x9d   :  { %v57_v21 = vrot.slane %v56_v19, 2  ;;  %v47_v22 = vrot.slane %v46_v20, 1 }
  0x9f   :  { %v58_v23 = vmax.f32 %v56_v19, %v57_v21  ;;  %v48_v24 = vmin.f32 %v46_v20, %v47_v22 }
  0xa1   :  { %95 = vpush %v48_v24  ;;  %v59_v25 = vrot.slane %v58_v23, 1 }
  0xa3   :  { %v60_v26 = vmax.f32 %v58_v23, %v59_v25 }
  0xa5   :  { %97 = vpush %v60_v26 }
  0xd2   :  { %s96_s0 = spop %95 }
  0xd3   :  { %v67_v29 = vstv %s96_s0 }
  0xd4   :  { %v68_v30 = vsub.f32 %v94_v2, %v67_v29 }
  0xd6   :  { %s98_s8 = spop %97 }
  0xd7   :  { %v62_v27 = vstv %s98_s8  ;;  %s66_s11 = smul.f32 0.003921569, %s98_s8 }
  0xd8   :  { %101 = vrcp.f32 %v62_v27 }
  0xd9   :  { %v76_v37 = vstv %s66_s11 }
  0xe5   :  { %v102_v28 = vpop.eup %101 }
  0xe6   :  { %99 = vpush %v102_v28 }
 0x117   :  { %s100_s9 = spop %99 }
 0x118   :  { %s65_s10 = smul.f32 255.0, %s100_s9 }
 0x11a   :  { %v69_v31 = vstv %s65_s10 }
 0x11b   :  { %v70_v32 = vmul.f32 %v69_v31, %v68_v30 }
 0x11d   :  { %vm71_vm1 = vcmp.lt.f32.partialorder %v70_v32, 0.0  ;;  %v72_v33 = vceil.f32 %v70_v32  ;;  %v73_v34 = vfloor.f32 %v70_v32 }
 0x11f   :  { %v74_v35 = vsel %vm71_vm1, %v72_v33, %v73_v34 }
 0x120   :  { %v75_v36 = vmin.f32 %v74_v35, 255.0 }
 0x122   :  { %v77_v38 = vmul.f32 %v76_v37, %v75_v36 }
 0x124   :  { %v78_v39 = vadd.f32 %v77_v38, %v67_v29 }
 0x126   :  { %83 = vst.msk [vmem:[%s120_s1] sm:$0x3] %vm81_vm2, %v78_v39 }

</bundles_post_ra>
